<compile_context>
chip_gen: v5e
topology: v5e:2x2
jax: 0.10.0
libtpu: 0.0.40
codegen_flags: <defaults>
</compile_context>

<pallas_src>
import jax
import jax.numpy as jnp
from jax.experimental import pallas as pl
from jax.experimental.pallas import tpu as pltpu


def cbam_kernel(x_ref, w1_ref, w2_ref, wconv_ref, o_ref):
    # x_ref: (Bblk, C, H*W) f32 block (NCHW with spatial dims flattened).
    x = x_ref[...]
    B, C, HW = x.shape

    # ---------------- Channel attention ----------------
    inv_hw = jnp.float32(1.0 / HW)
    avg_c = jnp.sum(x, axis=2) * inv_hw                  # (B, C)  AdaptiveAvgPool2d(1)
    max_c = jnp.max(x, axis=2)                           # (B, C)  AdaptiveMaxPool2d(1)

    # Single pass through the shared MLP on the stacked [avg; max] matrix.
    pooled = jnp.concatenate([avg_c, max_c], axis=0)     # (2B, C)
    h = jnp.maximum(
        jnp.dot(pooled, w1_ref[...], preferred_element_type=jnp.float32), 0.0)
    mlp = jnp.dot(h, w2_ref[...], preferred_element_type=jnp.float32)  # (2B, C)
    ca = jax.nn.sigmoid(mlp[:B] + mlp[B:])               # (B, C)

    x1 = x * ca[:, :, None]                              # channel-gated features

    # ---------------- Spatial attention ----------------
    inv_c = jnp.float32(1.0 / C)
    avg_sp = jnp.sum(x1, axis=1) * inv_c                 # (B, HW)  mean over C
    max_sp = jnp.max(x1, axis=1)                         # (B, HW)  max  over C

    # 7x7 conv (padding=3, 2->1 channels) as one MXU matmul with the
    # precomputed Toeplitz weight matrix.
    sp_in = jnp.concatenate([avg_sp, max_sp], axis=1)    # (B, 2*HW)
    conv = jnp.dot(sp_in, wconv_ref[...],
                   preferred_element_type=jnp.float32)   # (B, HW)
    sa = jax.nn.sigmoid(conv)

    o_ref[...] = (x1 * sa[:, None, :]).astype(o_ref.dtype)


def _conv7x7_as_matrix(w_sp, H, W):
    """Fold the 7x7, padding-3, 2->1 channel conv into a (2*H*W, H*W) matrix
    so that  conv(in).flatten() == concat([avg.flat, max.flat]) @ M."""
    K = w_sp.shape[-1]
    P = (K - 1) // 2
    dh = jnp.arange(H)[:, None] - jnp.arange(H)[None, :] + P   # (H_in, H_out)
    dw = jnp.arange(W)[:, None] - jnp.arange(W)[None, :] + P   # (W_in, W_out)
    vh = (dh >= 0) & (dh < K)
    vw = (dw >= 0) & (dw < K)
    kh = jnp.clip(dh, 0, K - 1)
    kw = jnp.clip(dw, 0, K - 1)
    # taps[c, hin, win, hout, wout] = w_sp[c, hin-hout+P, win-wout+P] (masked)
    taps = w_sp[:, kh[:, None, :, None], kw[None, :, None, :]]  # (2,H,W,H,W)
    mask = (vh[:, None, :, None] & vw[None, :, None, :]).astype(w_sp.dtype)
    return (taps * mask[None]).reshape(2 * H * W, H * W)


@jax.jit
def cbam_pallas(x_nchw, w1, w2, w_sp):
    """x_nchw: (N, C, H, W); w1: (C, C//r); w2: (C//r, C); w_sp: (2, 7, 7)."""
    N, C, H, W = x_nchw.shape
    HW = H * W
    x = x_nchw.reshape(N, C, HW).astype(jnp.float32)      # contiguous: free
    wconv = _conv7x7_as_matrix(w_sp.astype(jnp.float32), H, W)

    # Batch-block size: target ~1 MiB blocks, but keep >= 2 grid steps so both
    # TensorCores (v7x) can be used; bblk must divide N.
    per_img = C * HW * 4
    bblk = max(1, min(N, (1 << 20) // max(per_img, 1)))
    while bblk > 1 and N // bblk < 2:
        bblk -= 1
    while N % bblk:
        bblk -= 1
    grid = (N // bblk,)

    block_bytes = bblk * per_img
    weight_bytes = 4 * (w1.size + w2.size + wconv.size)
    vmem_limit = int(min(100 * 2**20,
                         max(4 * 2**20, 6 * block_bytes + 2 * weight_bytes)))

    out = pl.pallas_call(
        cbam_kernel,
        out_shape=jax.ShapeDtypeStruct((N, C, HW), jnp.float32),
        grid=grid,
        in_specs=[
            pl.BlockSpec((bblk, C, HW), lambda n: (n, 0, 0)),
            pl.BlockSpec(w1.shape, lambda n: (0, 0)),
            pl.BlockSpec(w2.shape, lambda n: (0, 0)),
            pl.BlockSpec(wconv.shape, lambda n: (0, 0)),
        ],
        out_specs=pl.BlockSpec((bblk, C, HW), lambda n: (n, 0, 0)),
        compiler_params=pltpu.CompilerParams(
            dimension_semantics=("parallel",),
            vmem_limit_bytes=vmem_limit),
    )(x, w1.astype(jnp.float32), w2.astype(jnp.float32), wconv)
    return out.reshape(N, C, H, W)                        # contiguous: free


def cbam_ref(x, w1, w2, w_sp):
    """Pure-JAX reference matching the PyTorch forward (NCHW)."""
    avg = jnp.mean(x, axis=(2, 3))
    mx = jnp.max(x, axis=(2, 3))

    def mlp(v):
        return jnp.maximum(v @ w1, 0.0) @ w2

    ca = jax.nn.sigmoid(mlp(avg) + mlp(mx))[:, :, None, None]
    x1 = x * ca
    avg_sp = jnp.mean(x1, axis=1, keepdims=True)
    max_sp = jnp.max(x1, axis=1, keepdims=True)
    sp_in = jnp.concatenate([avg_sp, max_sp], axis=1)          # (N, 2, H, W)
    conv = jax.lax.conv_general_dilated(
        sp_in, w_sp[None], window_strides=(1, 1),
        padding=((3, 3), (3, 3)),
        dimension_numbers=("NCHW", "OIHW", "NCHW"))
    sa = jax.nn.sigmoid(conv)
    return x1 * sa


if __name__ == "__main__":
    # Shapes consistent with CBAM(in_channels=32, reduction_ratio=16,
    # kernel_size=7): hidden = 32 // 16 = 2.
    N, C, H, W = 2, 32, 16, 16
    R = 16
    key = jax.random.PRNGKey(0)
    kx, k1, k2, k3 = jax.random.split(key, 4)

    x = jax.random.normal(kx, (N, C, H, W), jnp.float32)
    # Deterministic synthetic parameters (bias=False, matching the module).
    w1 = jax.random.normal(k1, (C, C // R), jnp.float32) * 0.2   # 1x1 conv C->C/r (transposed)
    w2 = jax.random.normal(k2, (C // R, C), jnp.float32) * 0.2   # 1x1 conv C/r->C (transposed)
    w_sp = jax.random.normal(k3, (2, 7, 7), jnp.float32) * 0.1   # 7x7 conv, 2->1 channels

    out = cbam_pallas(x, w1, w2, w_sp)
    out = jax.block_until_ready(out)

    ref = cbam_ref(x, w1, w2, w_sp)
    assert out.shape == (N, C, H, W)
    max_err = jnp.max(jnp.abs(out - ref))
    assert jnp.allclose(out, ref, atol=2e-3, rtol=2e-3), \
        f"max abs err {max_err}"

    print("KERNEL_OK")
</pallas_src>

<mosaic_0001>
module attributes {stable_mosaic.version = 11 : i64} {
  func.func @cbam_kernel(%arg0: i32, %arg1: memref<1x32x256xf32, #tpu.memory_space<vmem>>, %arg2: memref<32x2xf32, #tpu.memory_space<vmem>>, %arg3: memref<2x32xf32, #tpu.memory_space<vmem>>, %arg4: memref<512x256xf32, #tpu.memory_space<vmem>>, %arg5: memref<1x32x256xf32, #tpu.memory_space<vmem>>) attributes {dimension_semantics = [#tpu.dimension_semantics<parallel>], iteration_bounds = array<i64: 2>, scalar_prefetch = 0 : i64, scratch_operands = 0 : i64, tpu.core_type = #tpu.core_type<tc>, window_params = [{transform_indices = @transform_0, window_bounds = array<i64: 1, 32, 256>}, {pipeline_mode = #tpu.pipeline_mode<synchronous>, transform_indices = @transform_1, window_bounds = array<i64: 32, 2>}, {pipeline_mode = #tpu.pipeline_mode<synchronous>, transform_indices = @transform_2, window_bounds = array<i64: 2, 32>}, {pipeline_mode = #tpu.pipeline_mode<synchronous>, transform_indices = @transform_3, window_bounds = array<i64: 512, 256>}, {transform_indices = @transform_4, window_bounds = array<i64: 1, 32, 256>}]} {
    %c0 = arith.constant 0 : index
    %c0_0 = arith.constant 0 : index
    %c0_1 = arith.constant 0 : index
    %0 = vector.load %arg1[%c0, %c0_0, %c0_1] : memref<1x32x256xf32, #tpu.memory_space<vmem>>, vector<1x32x256xf32>
    %cst = arith.constant dense<0.000000e+00> : vector<1x32xf32>
    %1 = vector.multi_reduction <add>, %0, %cst [2] : vector<1x32x256xf32> to vector<1x32xf32>
    %cst_2 = arith.constant 3.906250e-03 : f32
    %2 = vector.broadcast %cst_2 : f32 to vector<1x32xf32>
    %3 = arith.mulf %1, %2 : vector<1x32xf32>
    %cst_3 = arith.constant dense<0xFF800000> : vector<1x32xf32>
    %4 = vector.multi_reduction <maximumf>, %0, %cst_3 [2] : vector<1x32x256xf32> to vector<1x32xf32>
    %5 = tpu.concatenate %3, %4 in 0 : vector<1x32xf32>, vector<1x32xf32> -> vector<2x32xf32>
    %c0_4 = arith.constant 0 : index
    %c0_5 = arith.constant 0 : index
    %6 = vector.load %arg2[%c0_4, %c0_5] : memref<32x2xf32, #tpu.memory_space<vmem>>, vector<32x2xf32>
    %cst_6 = arith.constant dense<0.000000e+00> : vector<2x2xf32>
    %7 = tpu.matmul %5, %6, %cst_6 {dimension_numbers = #tpu.dot_dimension_numbers<[1], [0], [0], [1], [0, 0, 1, 1], [], []>} : vector<2x32xf32>, vector<32x2xf32>, vector<2x2xf32> -> vector<2x2xf32>
    %cst_7 = arith.constant 0.000000e+00 : f32
    %8 = vector.broadcast %cst_7 : f32 to vector<2x2xf32>
    %9 = arith.maximumf %7, %8 : vector<2x2xf32>
    %c0_8 = arith.constant 0 : index
    %c0_9 = arith.constant 0 : index
    %10 = vector.load %arg3[%c0_8, %c0_9] : memref<2x32xf32, #tpu.memory_space<vmem>>, vector<2x32xf32>
    %cst_10 = arith.constant dense<0.000000e+00> : vector<2x32xf32>
    %11 = tpu.matmul %9, %10, %cst_10 {dimension_numbers = #tpu.dot_dimension_numbers<[1], [0], [0], [1], [0, 0, 1, 1], [], []>} : vector<2x2xf32>, vector<2x32xf32>, vector<2x32xf32> -> vector<2x32xf32>
    %12 = vector.extract_strided_slice %11 {offsets = [0, 0], sizes = [1, 32], strides = [1, 1]} : vector<2x32xf32> to vector<1x32xf32>
    %13 = vector.extract_strided_slice %11 {offsets = [1, 0], sizes = [1, 32], strides = [1, 1]} : vector<2x32xf32> to vector<1x32xf32>
    %14 = arith.addf %12, %13 : vector<1x32xf32>
    %15 = arith.negf %14 : vector<1x32xf32>
    %16 = math.exp %15 : vector<1x32xf32>
    %cst_11 = arith.constant 1.000000e+00 : f32
    %17 = vector.broadcast %cst_11 : f32 to vector<1x32xf32>
    %18 = arith.addf %17, %16 : vector<1x32xf32>
    %19 = arith.divf %17, %18 : vector<1x32xf32>
    %20 = vector.shape_cast %19 : vector<1x32xf32> to vector<1x32x1xf32>
    %21 = vector.broadcast %20 : vector<1x32x1xf32> to vector<1x32x256xf32>
    %22 = arith.mulf %0, %21 : vector<1x32x256xf32>
    %cst_12 = arith.constant dense<0.000000e+00> : vector<1x256xf32>
    %23 = vector.multi_reduction <add>, %22, %cst_12 [1] : vector<1x32x256xf32> to vector<1x256xf32>
    %cst_13 = arith.constant 3.125000e-02 : f32
    %24 = vector.broadcast %cst_13 : f32 to vector<1x256xf32>
    %25 = arith.mulf %23, %24 : vector<1x256xf32>
    %cst_14 = arith.constant dense<0xFF800000> : vector<1x256xf32>
    %26 = vector.multi_reduction <maximumf>, %22, %cst_14 [1] : vector<1x32x256xf32> to vector<1x256xf32>
    %27 = tpu.concatenate %25, %26 in 1 : vector<1x256xf32>, vector<1x256xf32> -> vector<1x512xf32>
    %c0_15 = arith.constant 0 : index
    %c0_16 = arith.constant 0 : index
    %28 = vector.load %arg4[%c0_15, %c0_16] : memref<512x256xf32, #tpu.memory_space<vmem>>, vector<512x256xf32>
    %cst_17 = arith.constant dense<0.000000e+00> : vector<1x256xf32>
    %29 = tpu.matmul %27, %28, %cst_17 {dimension_numbers = #tpu.dot_dimension_numbers<[1], [0], [0], [1], [0, 0, 1, 1], [], []>} : vector<1x512xf32>, vector<512x256xf32>, vector<1x256xf32> -> vector<1x256xf32>
    %30 = arith.negf %29 : vector<1x256xf32>
    %31 = math.exp %30 : vector<1x256xf32>
    %cst_18 = arith.constant 1.000000e+00 : f32
    %32 = vector.broadcast %cst_18 : f32 to vector<1x256xf32>
    %33 = arith.addf %32, %31 : vector<1x256xf32>
    %34 = arith.divf %32, %33 : vector<1x256xf32>
    %35 = vector.shape_cast %34 : vector<1x256xf32> to vector<1x1x256xf32>
    %36 = vector.broadcast %35 : vector<1x1x256xf32> to vector<1x32x256xf32>
    %37 = arith.mulf %22, %36 : vector<1x32x256xf32>
    %c0_19 = arith.constant 0 : index
    %c0_20 = arith.constant 0 : index
    %c0_21 = arith.constant 0 : index
    %38 = vector.load %arg5[%c0_19, %c0_20, %c0_21] : memref<1x32x256xf32, #tpu.memory_space<vmem>>, vector<1x32x256xf32>
    tpu.vector_store %arg5[%c0_19, %c0_20, %c0_21], %37 {strides = array<i32>} : memref<1x32x256xf32, #tpu.memory_space<vmem>>, vector<1x32x256xf32>,
    return
  }
  func.func @transform_0(%arg0: i32) -> (i32, i32, i32) {
    %c0_i32 = arith.constant 0 : i32
    %c0_i32_0 = arith.constant 0 : i32
    %c0_i32_1 = arith.constant 0 : i32
    return %arg0, %c0_i32, %c0_i32_0 : i32, i32, i32
  }
  func.func @transform_1(%arg0: i32) -> (i32, i32) {
    %c0_i32 = arith.constant 0 : i32
    %c0_i32_0 = arith.constant 0 : i32
    %c0_i32_1 = arith.constant 0 : i32
    return %c0_i32, %c0_i32_0 : i32, i32
  }
  func.func @transform_2(%arg0: i32) -> (i32, i32) {
    %c0_i32 = arith.constant 0 : i32
    %c0_i32_0 = arith.constant 0 : i32
    %c0_i32_1 = arith.constant 0 : i32
    return %c0_i32, %c0_i32_0 : i32, i32
  }
  func.func @transform_3(%arg0: i32) -> (i32, i32) {
    %c0_i32 = arith.constant 0 : i32
    %c0_i32_0 = arith.constant 0 : i32
    %c0_i32_1 = arith.constant 0 : i32
    return %c0_i32, %c0_i32_0 : i32, i32
  }
  func.func @transform_4(%arg0: i32) -> (i32, i32, i32) {
    %c0_i32 = arith.constant 0 : i32
    %c0_i32_0 = arith.constant 0 : i32
    %c0_i32_1 = arith.constant 0 : i32
    return %arg0, %c0_i32, %c0_i32_0 : i32, i32, i32
  }
}

</mosaic_0001>

<bundles_post_ra>
// kernel: cbam_pallas.1
= control target key start
LH: loop header
LB: loop body
LE: loop exit
PB: predicated region body
PF: predicated region fallthrough
CT: control target
= control target key end

     0   :  { %s896_s15 = smov 0   ;;  %s1405_s0 = inlined_call_operand.vmem [shape: f32[2,32,256], index: 0, kind: input, shape index: {}]   ;;  %s1406_s1 = inlined_call_operand.vmem [shape: f32[32,2], index: 1, kind: input, shape index: {}]   ;;  %s1407_s2 = inlined_call_operand.vmem [shape: f32[2,32], index: 2, kind: input, shape index: {}]   ;;  %s1408_s3 = inlined_call_operand.vmem [shape: f32[512,256], index: 3, kind: input, shape index: {}]   ;;  %s1409_s4 = inlined_call_operand.vmem [shape: f32[2,32,256], index: 4, kind: output, shape index: {}]  }
   0x1 LB: > { %s819_s16 = sadd.s32 4294967295, %s869_s15   ;;  %p823_p0 = scmp.ge.s32.totalorder %s869_s15, 1  ;;  %s869_s15 = sphi %s896_s15, %s14_s15  }
   0x2   : > { %p162_p1 = scmp.lt.s32.totalorder %s869_s15, 3 }
   0x4   : > { %p163_p2 = pnand %p823_p0, %p162_p1 }
   0x5   : > { %p188_p3 = scmp.lt.s32.totalorder (!%p163_p2), %s819_s16, 1 }
   0x6   : > { %166 = sbr.rel (%p163_p2) target bundleno = 762 (0x2fa), region = 36 }
   0xb   : > { %s1411_s16 = smov (!%p188_p3, %s819_s16), 1  ;;  %v271_v16 = vld [vmem:[%s1406_s1 + $0x18] sm:$0xff]  ;;  %v270_v17 = vld [vmem:[%s1406_s1 + $0x10] sm:$0xff]  ;;  %v269_v18 = vld [vmem:[%s1406_s1 + $0x8] sm:$0xff]  ;;  %v238_v23 = vlaneseq  ;;  %vm243_vm0 = vcmask 130112   ;;  %vm247_vm1 = vcmask 195712  }
   0xc   : > { %s836_s17 = sshll.u32 %s1411_s16, 6  ;;  %288 = vmatpush.msra.mxu0 %v271_v16  ;;  %v268_v19 = vld [vmem:[%s1406_s1] sm:$0xff]  ;;  %vm251_vm2 = vcmask 261312   ;;  %vm266_vm3 = vcmask 1040384   ;;  %vm272_vm4 = vcmask 261120   ;;  %vm302_vm5 = vcmask 1041408  }
   0xd   : > { %s192_s20 = scalar_lea.vmem %s1405_s0, %s836_s17  ;;  %v239_v24 = vand.u32 127, %v238_v23  ;;  %v297_v52 = vld [vmem:[%s1407_s2] sm:$0x3]  ;;  %vm298_vm6 = vcmask 15360   ;;  %v959_v55 = vshrl.u32 %v238_v23, 7  ;;  %v542_v16 = vld [vmem:[%s1408_s3 + $0x3d0] sm:$0xff]  ;;  %s197_s10 = scalar_lea.vmem %s1409_s4, %s836_s17 }
   0xe   : > { %v912_v0 = vld [vmem:[%s192_s20] sm:$0xff]  ;;  %v914_v1 = vld [vmem:[%s192_s20 + $0x8] sm:$0xff]  ;;  %v926_v7 = vld [vmem:[%s192_s20 + $0x10] sm:$0xff]  ;;  %289 = vmatpush.msra.mxu0 %v270_v17  ;;  %829 = vmatpush.msk.msra.mxu1 %vm302_vm5, %v297_v52 }
   0xf   : > { %v916_v2 = vld [vmem:[%s192_s20 + $0x20] sm:$0xff]  ;;  %v222_v3 = vmax.f32 %v912_v0, %v914_v1  ;;  %v206_v4 = vadd.f32 %v914_v1, %v912_v0  ;;  %v922_v5 = vld [vmem:[%s192_s20 + $0x28] sm:$0xff]  ;;  %v928_v8 = vld [vmem:[%s192_s20 + $0x18] sm:$0xff]  ;;  %v241_v27 = vadd.s32 4294967288, %v239_v24  ;;  %v245_v30 = vadd.s32 4294967280, %v239_v24  ;;  %846 = vset.pattern.permute.xlu2 %v959_v55 }
  0x10   : > { %v212_v6 = vadd.f32 %v922_v5, %v916_v2  ;;  %v930_v9 = vld [vmem:[%s192_s20 + $0x30] sm:$0xff]  ;;  %v932_v10 = vld [vmem:[%s192_s20 + $0x38] sm:$0xff]  ;;  %v225_v11 = vmax.f32 %v926_v7, %v928_v8  ;;  %v209_v12 = vadd.f32 %v928_v8, %v926_v7  ;;  %v228_v14 = vmax.f32 %v916_v2, %v922_v5  ;;  %290 = vmatpush.msra.mxu0 %v269_v18  ;;  %v448_v17 = vld [vmem:[%s1408_s3 + $0xe0] sm:$0xff] }
  0x11   : > { %223 = vmax.xlane.f32.xlu2 %v222_v3  ;;  %207 = vadd.xlane.f32.xlu0 %v206_v4  ;;  %v215_v13 = vadd.f32 %v932_v10, %v930_v9  ;;  %v231_v15 = vmax.f32 %v930_v9, %v932_v10  ;;  %v249_v35 = vadd.s32 4294967272, %v239_v24  ;;  %v364_v56 = vadd.s32 16, %v959_v55  ;;  %v514_v3 = vld [vmem:[%s1408_s3 + $0x2f0] sm:$0xff]  ;;  %v436_v52 = vld [vmem:[%s1408_s3 + $0x80] sm:$0xff] }
  0x12   : > { %213 = vadd.xlane.f32.xlu1 %v212_v6  ;;  %291 = vmatpush.msra.mxu0 %v268_v19  ;;  %v358_v57 = vadd.s32 8, %v959_v55  ;;  %v546_v4 = vld [vmem:[%s1408_s3 + $0x3f0] sm:$0xff]  ;;  %v512_v6 = vld [vmem:[%s1408_s3 + $0x2e0] sm:$0xff] }
  0x13   : > { %848 = vset.pattern.permute.xlu1 %v364_v56  ;;  %588 = vmatpush.msrb.mxu1 %v514_v3  ;;  %v480_v19 = vld [vmem:[%s1408_s3 + $0x1e0] sm:$0xff]  ;;  %v478_v23 = vld [vmem:[%s1408_s3 + $0x1d0] sm:$0xff] }
  0x14   : > { %847 = vset.pattern.permute.xlu0 %v358_v57  ;;  %608 = vmatpush.msrb.mxu0 %v546_v4  ;;  %v434_v56 = vld [vmem:[%s1408_s3 + $0x70] sm:$0xff] }
  0x15   : > { %589 = vmatpush.msrb.mxu1 %v512_v6  ;;  %v466_v57 = vld [vmem:[%s1408_s3 + $0x170] sm:$0xff] }
  0x16   : > { %v430_v3 = vld [vmem:[%s1408_s3 + $0x50] sm:$0xff] }
  0x17   : > { %v462_v4 = vld [vmem:[%s1408_s3 + $0x150] sm:$0xff] }
  0x18   : > { %v490_v6 = vld [vmem:[%s1408_s3 + $0x230] sm:$0xff] }
  0x19   : > { %226 = vmax.xlane.f32.xlu2 %v225_v11  ;;  %210 = vadd.xlane.f32.xlu0 %v209_v12  ;;  %v544_v11 = vld [vmem:[%s1408_s3 + $0x3e0] sm:$0xff]  ;;  %v450_v12 = vld [vmem:[%s1408_s3 + $0xf0] sm:$0xff] }
  0x1a   : > { %216 = vadd.xlane.f32.xlu1 %v215_v13  ;;  %v482_v13 = vld [vmem:[%s1408_s3 + $0x1f0] sm:$0xff]  ;;  %548 = vmatpush.msra.mxu2 %v450_v12  ;;  %v428_v12 = vld [vmem:[%s1408_s3 + $0x40] sm:$0xff] }
  0x1b   : > { %568 = vmatpush.msra.mxu3 %v482_v13  ;;  %609 = vmatpush.msrb.mxu0 %v544_v11  ;;  %v522_v11 = vld [vmem:[%s1408_s3 + $0x330] sm:$0xff]  ;;  %v460_v13 = vld [vmem:[%s1408_s3 + $0x140] sm:$0xff] }
  0x1c   : > { %549 = vmatpush.msra.mxu2 %v448_v17  ;;  %v458_v17 = vld [vmem:[%s1408_s3 + $0x130] sm:$0xff] }
  0x1d   : > { %569 = vmatpush.msra.mxu3 %v480_v19  ;;  %610 = vmatpush.msrb.mxu0 %v542_v16  ;;  %v426_v16 = vld [vmem:[%s1408_s3 + $0x30] sm:$0xff] }
  0x1e   : > { %v518_v19 = vld [vmem:[%s1408_s3 + $0x310] sm:$0xff] }
  0x1f   : > { %570 = vmatpush.msra.mxu3 %v478_v23  ;;  %v516_v23 = vld [vmem:[%s1408_s3 + $0x300] sm:$0xff] }
  0x21   : > { %229 = vmax.xlane.f32.xlu0 %v228_v14 }
  0x22   : > { %232 = vmax.xlane.f32.xlu1 %v231_v15  ;;  %v510_v15 = vld [vmem:[%s1408_s3 + $0x2d0] sm:$0xff] }
  0x23   : > { %590 = vmatpush.msrb.mxu1 %v510_v15  ;;  %v520_v15 = vld [vmem:[%s1408_s3 + $0x320] sm:$0xff] }
  0x84   : > { %v208_v20 = vpop.xlane.xlu0 %207  ;;  %v224_v21 = vpop.xlane.xlu2 %223 }
  0x85   : > { %v214_v22 = vpop.xlane.xlu1 %213  ;;  %v218_v25 = vmul.f32 0.00390625, %v208_v20  ;;  %v258_v37 = vperm.slane %v224_v21, %v239_v24  ;;  %v508_v20 = vld [vmem:[%s1408_s3 + $0x2c0] sm:$0xff] }
  0x86   : > { %v220_v31 = vmul.f32 0.00390625, %v214_v22  ;;  %v540_v21 = vld [vmem:[%s1408_s3 + $0x3c0] sm:$0xff]  ;;  %v446_v22 = vld [vmem:[%s1408_s3 + $0xd0] sm:$0xff]  ;;  %591 = vmatpush.msrb.mxu1 %v508_v20 }
  0x87   : > { %v240_v34 = vperm.slane %v218_v25, %v239_v24  ;;  %v444_v25 = vld [vmem:[%s1408_s3 + $0xc0] sm:$0xff]  ;;  %550 = vmatpush.msra.mxu2 %v446_v22  ;;  %611 = vmatpush.msrb.mxu0 %v540_v21 }
  0x88   : > { %v246_v40 = vperm.slane %v220_v31, %v245_v30  ;;  %v424_v20 = vld [vmem:[%s1408_s3 + $0x20] sm:$0xff] }
  0x89   : > { %551 = vmatpush.msra.mxu2 %v444_v25  ;;  %v456_v21 = vld [vmem:[%s1408_s3 + $0x120] sm:$0xff]  ;;  %v547_v25 = vld [vmem:[%s1408_s3 + $0x3f8] sm:$0xff] }
  0x8a   : > { %v484_v22 = vld [vmem:[%s1408_s3 + $0x200] sm:$0xff] }
  0x8c   : > { %v211_v26 = vpop.xlane.xlu0 %210  ;;  %v227_v32 = vpop.xlane.xlu2 %226 }
  0x8d   : > { %v219_v28 = vmul.f32 0.00390625, %v211_v26  ;;  %v217_v29 = vpop.xlane.xlu1 %216  ;;  %v259_v38 = vperm.slane %v227_v32, %v241_v27  ;;  %v504_v32 = vld [vmem:[%s1408_s3 + $0x2a0] sm:$0xff] }
  0x8e   : > { %v221_v36 = vmul.f32 0.00390625, %v217_v29  ;;  %v476_v29 = vld [vmem:[%s1408_s3 + $0x1c0] sm:$0xff] }
  0x8f   : > { %v242_v33 = vperm.slane %v219_v28, %v241_v27  ;;  %v260_v46 = vsel %vm243_vm0, %v259_v38, %v258_v37  ;;  %v506_v27 = vld [vmem:[%s1408_s3 + $0x2b0] sm:$0xff]  ;;  %571 = vmatpush.msra.mxu3 %v476_v29  ;;  %v545_v29 = vld [vmem:[%s1408_s3 + $0x3e8] sm:$0xff] }
  0x90   : > { %v250_v41 = vperm.slane %v221_v36, %v249_v35  ;;  %v538_v28 = vld [vmem:[%s1408_s3 + $0x3b0] sm:$0xff]  ;;  %592 = vmatpush.msrb.mxu1 %v506_v27 }
  0x91   : > { %v244_v39 = vsel %vm243_vm0, %v242_v33, %v240_v34  ;;  %v536_v33 = vld [vmem:[%s1408_s3 + $0x3a0] sm:$0xff]  ;;  %612 = vmatpush.msrb.mxu0 %v538_v28  ;;  %v454_v27 = vld [vmem:[%s1408_s3 + $0x110] sm:$0xff]  ;;  %v513_v28 = vld [vmem:[%s1408_s3 + $0x2e8] sm:$0xff] }
  0x92   : > { %v248_v45 = vsel %vm247_vm1, %v246_v40, %v244_v39  ;;  %593 = vmatpush.msrb.mxu1 %v504_v32  ;;  %v370_v39 = vadd.s32 24, %v959_v55  ;;  %v442_v40 = vld [vmem:[%s1408_s3 + $0xb0] sm:$0xff]  ;;  %v528_v55 = vld [vmem:[%s1408_s3 + $0x360] sm:$0xff]  ;;  %v451_v32 = vld [vmem:[%s1408_s3 + $0xf8] sm:$0xff] }
  0x93   : > { %v252_v49 = vsel %vm251_vm2, %v250_v41, %v248_v45  ;;  %613 = vmatpush.msrb.mxu0 %v536_v33  ;;  %v474_v41 = vld [vmem:[%s1408_s3 + $0x1b0] sm:$0xff]  ;;  %552 = vmatpush.msra.mxu2 %v442_v40  ;;  %v472_v45 = vld [vmem:[%s1408_s3 + $0x1a0] sm:$0xff]  ;;  %v483_v33 = vld [vmem:[%s1408_s3 + $0x1f8] sm:$0xff] }
  0x94   : > { %v230_v42 = vpop.xlane.xlu0 %229  ;;  %572 = vmatpush.msra.mxu3 %v474_v41  ;;  %v447_v40 = vld [vmem:[%s1408_s3 + $0xd8] sm:$0xff] }
  0x95   : > { %v261_v43 = vperm.slane %v230_v42, %v245_v30  ;;  %v233_v44 = vpop.xlane.xlu1 %232  ;;  %v502_v42 = vld [vmem:[%s1408_s3 + $0x290] sm:$0xff]  ;;  %v479_v41 = vld [vmem:[%s1408_s3 + $0x1d8] sm:$0xff] }
  0x96   : > { %v263_v47 = vperm.slane %v233_v44, %v249_v35  ;;  %v440_v44 = vld [vmem:[%s1408_s3 + $0xa0] sm:$0xff]  ;;  %594 = vmatpush.msrb.mxu1 %v502_v42  ;;  %573 = vmatpush.msra.mxu3 %v472_v45  ;;  %v507_v42 = vld [vmem:[%s1408_s3 + $0x2b8] sm:$0xff]  ;;  %v477_v45 = vld [vmem:[%s1408_s3 + $0x1c8] sm:$0xff] }
  0x97   : > { %v262_v48 = vsel %vm247_vm1, %v261_v43, %v260_v46  ;;  %v534_v43 = vld [vmem:[%s1408_s3 + $0x390] sm:$0xff]  ;;  %v500_v46 = vld [vmem:[%s1408_s3 + $0x280] sm:$0xff]  ;;  %553 = vmatpush.msra.mxu2 %v440_v44  ;;  %v445_v44 = vld [vmem:[%s1408_s3 + $0xc8] sm:$0xff] }
  0x98   : > { %v264_v50 = vsel %vm251_vm2, %v263_v47, %v262_v48  ;;  %614 = vmatpush.msrb.mxu0 %v534_v43  ;;  %v532_v47 = vld [vmem:[%s1408_s3 + $0x380] sm:$0xff]  ;;  %v438_v48 = vld [vmem:[%s1408_s3 + $0x90] sm:$0xff]  ;;  %595 = vmatpush.msrb.mxu1 %v500_v46  ;;  %v539_v43 = vld [vmem:[%s1408_s3 + $0x3b8] sm:$0xff] }
  0x99   : > { %v267_v51 = vsel %vm266_vm3, %v252_v49, %v264_v50  ;;  %v470_v49 = vld [vmem:[%s1408_s3 + $0x190] sm:$0xff]  ;;  %554 = vmatpush.msra.mxu2 %v438_v48  ;;  %v505_v46 = vld [vmem:[%s1408_s3 + $0x2a8] sm:$0xff]  ;;  %v443_v48 = vld [vmem:[%s1408_s3 + $0xb8] sm:$0xff] }
  0x9a   : > { %828 = vmatmul.msk.f32.vlgmr.msra.gmra.mxu0 %vm272_vm4, %v267_v51  ;;  %v498_v50 = vld [vmem:[%s1408_s3 + $0x270] sm:$0xff]  ;;  %574 = vmatpush.msra.mxu3 %v470_v49  ;;  %v475_v49 = vld [vmem:[%s1408_s3 + $0x1b8] sm:$0xff] }
  0x9b   : > { %v530_v51 = vld [vmem:[%s1408_s3 + $0x370] sm:$0xff]  ;;  %615 = vmatpush.msrb.mxu0 %v532_v47  ;;  %596 = vmatpush.msrb.mxu1 %v498_v50  ;;  %v537_v47 = vld [vmem:[%s1408_s3 + $0x3a8] sm:$0xff]  ;;  %v503_v50 = vld [vmem:[%s1408_s3 + $0x298] sm:$0xff] }
  0x9c   : > { %555 = vmatpush.msra.mxu2 %v436_v52  ;;  %v441_v52 = vld [vmem:[%s1408_s3 + $0xa8] sm:$0xff] }
  0x9d   : > { %616 = vmatpush.msrb.mxu0 %v530_v51  ;;  %v535_v51 = vld [vmem:[%s1408_s3 + $0x398] sm:$0xff] }
  0x9e   : > { %556 = vmatpush.msra.mxu2 %v434_v56  ;;  %v439_v56 = vld [vmem:[%s1408_s3 + $0x98] sm:$0xff] }
  0x9f   : > { %617 = vmatpush.msrb.mxu0 %v528_v55  ;;  %v533_v55 = vld [vmem:[%s1408_s3 + $0x388] sm:$0xff] }
 0x117   : > { %v293_v53 = vpop.f32.mrf.mxu0 }
 0x118   : > { %v296_v54 = vmax.f32 %v293_v53, 0.0  ;;  %v468_v53 = vld [vmem:[%s1408_s3 + $0x180] sm:$0xff] }
 0x119   : > { %575 = vmatpush.msra.mxu3 %v468_v53  ;;  %v473_v53 = vld [vmem:[%s1408_s3 + $0x1a8] sm:$0xff] }
 0x11a   : > { %830 = vmatmul.msk.f32.vlgmr.msra.gmra.mxu1 %vm298_vm6, %v296_v54  ;;  %v496_v54 = vld [vmem:[%s1408_s3 + $0x260] sm:$0xff] }
 0x11b   : > { %597 = vmatpush.msrb.mxu1 %v496_v54  ;;  %576 = vmatpush.msra.mxu3 %v466_v57  ;;  %v501_v54 = vld [vmem:[%s1408_s3 + $0x288] sm:$0xff]  ;;  %v471_v57 = vld [vmem:[%s1408_s3 + $0x198] sm:$0xff] }
 0x197   : > { %v323_v58 = vpop.f32.mrf.mxu1 }
 0x198   : > { %v327_v59 = vrot.slane %v323_v58, 1 }
 0x19a   : > { %v329_v60 = vadd.f32 %v327_v59, %v323_v58  ;;  %v494_v58 = vld [vmem:[%s1408_s3 + $0x250] sm:$0xff] }
 0x19b   : > { %v526_v59 = vld [vmem:[%s1408_s3 + $0x350] sm:$0xff]  ;;  %598 = vmatpush.msrb.mxu1 %v494_v58  ;;  %v499_v58 = vld [vmem:[%s1408_s3 + $0x278] sm:$0xff] }
 0x19c   : > { %v831_v61 = vmul.f32 -1.442695, %v329_v60  ;;  %v432_v60 = vld [vmem:[%s1408_s3 + $0x60] sm:$0xff]  ;;  %618 = vmatpush.msrb.mxu0 %v526_v59  ;;  %v531_v59 = vld [vmem:[%s1408_s3 + $0x378] sm:$0xff] }
 0x19d   : > { %557 = vmatpush.msra.mxu2 %v432_v60  ;;  %v437_v60 = vld [vmem:[%s1408_s3 + $0x88] sm:$0xff] }
 0x19e   : > { %851 = vpow2.f32 %v831_v61  ;;  %v464_v61 = vld [vmem:[%s1408_s3 + $0x160] sm:$0xff] }
 0x19f   : > { %577 = vmatpush.msra.mxu3 %v464_v61  ;;  %558 = vmatpush.msra.mxu2 %v430_v3  ;;  %v469_v61 = vld [vmem:[%s1408_s3 + $0x188] sm:$0xff]  ;;  %v435_v3 = vld [vmem:[%s1408_s3 + $0x78] sm:$0xff] }
 0x1a1   : > { %578 = vmatpush.msra.mxu3 %v462_v4  ;;  %559 = vmatpush.msra.mxu2 %v428_v12  ;;  %v467_v4 = vld [vmem:[%s1408_s3 + $0x178] sm:$0xff]  ;;  %v433_v12 = vld [vmem:[%s1408_s3 + $0x68] sm:$0xff] }
 0x1a3   : > { %579 = vmatpush.msra.mxu3 %v460_v13  ;;  %560 = vmatpush.msra.mxu2 %v426_v16  ;;  %v465_v13 = vld [vmem:[%s1408_s3 + $0x168] sm:$0xff]  ;;  %v431_v16 = vld [vmem:[%s1408_s3 + $0x58] sm:$0xff] }
 0x1a4   : > { %v852_v62 = vpop.eup %851 }
 0x1a5   : > { %v333_v63 = vadd.f32 1.0, %v852_v62  ;;  %v492_v62 = vld [vmem:[%s1408_s3 + $0x240] sm:$0xff]  ;;  %580 = vmatpush.msra.mxu3 %v458_v17  ;;  %561 = vmatpush.msra.mxu2 %v424_v20  ;;  %v463_v17 = vld [vmem:[%s1408_s3 + $0x158] sm:$0xff]  ;;  %v429_v20 = vld [vmem:[%s1408_s3 + $0x48] sm:$0xff] }
 0x1a6   : > { %599 = vmatpush.msrb.mxu1 %v492_v62  ;;  %v497_v62 = vld [vmem:[%s1408_s3 + $0x268] sm:$0xff] }
 0x1a7   : > { %853 = vrcp.f32 %v333_v63  ;;  %v345_v26 = vand.u32 2147483648, %v333_v63  ;;  %v343_v31 = vand.u32 2147483647, %v333_v63  ;;  %vm339_vm8 = vweird.f32 %v333_v63  ;;  %581 = vmatpush.msra.mxu3 %v456_v21  ;;  %v461_v21 = vld [vmem:[%s1408_s3 + $0x148] sm:$0xff] }
 0x1a8   : > { %600 = vmatpush.msrb.mxu1 %v490_v6  ;;  %v495_v6 = vld [vmem:[%s1408_s3 + $0x258] sm:$0xff] }
 0x1a9   : > { %v346_v35 = vor.u32 1.1754944e-38, %v345_v26  ;;  %vm344_vm10 = vcmp.eq.f32.partialorder %v343_v31, 8.507059e+37  ;;  %v422_v26 = vld [vmem:[%s1408_s3 + $0x10] sm:$0xff]  ;;  %v452_v31 = vld [vmem:[%s1408_s3 + $0x100] sm:$0xff]  ;;  %582 = vmatpush.msra.mxu3 %v454_v27  ;;  %v487_v27 = vld [vmem:[%s1408_s3 + $0x218] sm:$0xff] }
 0x1aa   : > { %562 = vmatpush.msra.mxu2 %v422_v26  ;;  %v459_v26 = vld [vmem:[%s1408_s3 + $0x138] sm:$0xff] }
 0x1ab   : > { %583 = vmatpush.msra.mxu3 %v452_v31  ;;  %v485_v31 = vld [vmem:[%s1408_s3 + $0x208] sm:$0xff] }
 0x1ad   : > { %v854_v14 = vpop.eup %853  ;;  %648 = vmatpush.msrb.mxu3 %v483_v33  ;;  %v423_v33 = vld [vmem:[%s1408_s3 + $0x18] sm:$0xff] }
 0x1ae   : > { %v335_v18 = vmul.f32 %v854_v14, %v333_v63  ;;  %vm340_vm7 = vweird.f32 %v854_v14  ;;  %v524_v63 = vld [vmem:[%s1408_s3 + $0x340] sm:$0xff] }
 0x1af   : > { %vm341_vm9 = vmor %vm339_vm8, %vm340_vm7  ;;  %619 = vmatpush.msrb.mxu0 %v524_v63  ;;  %v529_v63 = vld [vmem:[%s1408_s3 + $0x368] sm:$0xff] }
 0x1b0   : > { %v336_v24 = vsub.f32 1.0, %v335_v18  ;;  %v486_v18 = vld [vmem:[%s1408_s3 + $0x210] sm:$0xff] }
 0x1b1   : > { %620 = vmatpush.msrb.mxu0 %v522_v11  ;;  %v527_v11 = vld [vmem:[%s1408_s3 + $0x358] sm:$0xff] }
 0x1b2   : > { %v337_v30 = vmul.f32 %v854_v14, %v336_v24  ;;  %v515_v24 = vld [vmem:[%s1408_s3 + $0x2f8] sm:$0xff] }
 0x1b3   : > { %621 = vmatpush.msrb.mxu0 %v520_v15  ;;  %v525_v15 = vld [vmem:[%s1408_s3 + $0x348] sm:$0xff] }
 0x1b4   : > { %v338_v34 = vadd.f32 %v854_v14, %v337_v30  ;;  %v420_v30 = vld [vmem:[%s1408_s3] sm:$0xff] }
 0x1b5   : > { %622 = vmatpush.msrb.mxu0 %v518_v19  ;;  %563 = vmatpush.msra.mxu2 %v420_v30  ;;  %v523_v19 = vld [vmem:[%s1408_s3 + $0x338] sm:$0xff]  ;;  %v457_v30 = vld [vmem:[%s1408_s3 + $0x128] sm:$0xff] }
 0x1b6   : > { %v342_v36 = vsel %vm341_vm9, %v854_v14, %v338_v34  ;;  %v488_v14 = vld [vmem:[%s1408_s3 + $0x220] sm:$0xff]  ;;  %v511_v34 = vld [vmem:[%s1408_s3 + $0x2d8] sm:$0xff] }
 0x1b7   : > { %v347_v37 = vsel %vm344_vm10, %v346_v35, %v342_v36  ;;  %601 = vmatpush.msrb.mxu1 %v488_v14  ;;  %623 = vmatpush.msrb.mxu0 %v516_v23  ;;  %v543_v35 = vld [vmem:[%s1408_s3 + $0x3d8] sm:$0xff]  ;;  %v449_v36 = vld [vmem:[%s1408_s3 + $0xe8] sm:$0xff] }
 0x1b8   : > { %v349_v38 = vperm.slane %v347_v37, 0  ;;  %628 = vmatpush.msrb.mxu2 %v451_v32  ;;  %v481_v37 = vld [vmem:[%s1408_s3 + $0x1e8] sm:$0xff] }
 0x1b9   : > { %602 = vmatpush.msrb.mxu1 %v486_v18  ;;  %688 = vmatpush.msra.mxu0 %v547_v25  ;;  %v493_v14 = vld [vmem:[%s1408_s3 + $0x248] sm:$0xff]  ;;  %v491_v18 = vld [vmem:[%s1408_s3 + $0x238] sm:$0xff] }
 0x1ba   : > { %366 = vperm.xlu1 %848, %v349_v38   ;;  %360 = vperm.xlu0 %847, %v349_v38   ;;  %v521_v23 = vld [vmem:[%s1408_s3 + $0x328] sm:$0xff]  ;;  %v427_v25 = vld [vmem:[%s1408_s3 + $0x38] sm:$0xff] }
 0x1bb   : > { %354 = vperm.xlu2 %846, %v349_v38   ;;  %603 = vmatpush.msrb.mxu1 %v484_v22  ;;  %v489_v22 = vld [vmem:[%s1408_s3 + $0x228] sm:$0xff] }
 0x1bc   : > { %689 = vmatpush.msra.mxu0 %v545_v29  ;;  %629 = vmatpush.msrb.mxu2 %v449_v36  ;;  %v425_v29 = vld [vmem:[%s1408_s3 + $0x28] sm:$0xff] }
 0x1bd   : > { %668 = vmatpush.msra.mxu1 %v515_v24  ;;  %649 = vmatpush.msrb.mxu3 %v481_v37  ;;  %v517_v32 = vld [vmem:[%s1408_s3 + $0x308] sm:$0xff] }
 0x1be   : > { %690 = vmatpush.msra.mxu0 %v543_v35  ;;  %630 = vmatpush.msrb.mxu2 %v447_v40  ;;  %v421_v35 = vld [vmem:[%s1408_s3 + $0x8] sm:$0xff] }
 0x1bf   : > { %669 = vmatpush.msra.mxu1 %v513_v28  ;;  %650 = vmatpush.msrb.mxu3 %v479_v41  ;;  %v519_v28 = vld [vmem:[%s1408_s3 + $0x318] sm:$0xff]  ;;  %v453_v36 = vld [vmem:[%s1408_s3 + $0x108] sm:$0xff] }
 0x1c0   : > { %631 = vmatpush.msrb.mxu2 %v445_v44 }
 0x1c1   : > { %670 = vmatpush.msra.mxu1 %v511_v34  ;;  %651 = vmatpush.msrb.mxu3 %v477_v45  ;;  %v455_v34 = vld [vmem:[%s1408_s3 + $0x118] sm:$0xff] }
 0x1c2   : > { %850 = vset.pattern.permute.xlu0 %v370_v39  ;;  %632 = vmatpush.msrb.mxu2 %v443_v48 }
 0x1c3   : > { %849 = vset.pattern.permute.xlu2 %v370_v39  ;;  %v541_v39 = vld [vmem:[%s1408_s3 + $0x3c8] sm:$0xff]  ;;  %652 = vmatpush.msrb.mxu3 %v475_v49 }
 0x1c4   : > { %691 = vmatpush.msra.mxu0 %v541_v39  ;;  %633 = vmatpush.msrb.mxu2 %v441_v52 }
 0x1c5   : > { %653 = vmatpush.msrb.mxu3 %v473_v53 }
 0x1c6   : > { %692 = vmatpush.msra.mxu0 %v539_v43  ;;  %634 = vmatpush.msrb.mxu2 %v439_v56 }
 0x1c7   : > { %654 = vmatpush.msrb.mxu3 %v471_v57 }
 0x1c8   : > { %693 = vmatpush.msra.mxu0 %v537_v47  ;;  %635 = vmatpush.msrb.mxu2 %v437_v60 }
 0x1c9   : > { %655 = vmatpush.msrb.mxu3 %v469_v61 }
 0x1ca   : > { %694 = vmatpush.msra.mxu0 %v535_v51  ;;  %636 = vmatpush.msrb.mxu2 %v435_v3 }
 0x1cb   : > { %372 = vperm.xlu2 %849, %v349_v38   ;;  %v509_v38 = vld [vmem:[%s1408_s3 + $0x2c8] sm:$0xff]  ;;  %656 = vmatpush.msrb.mxu3 %v467_v4 }
 0x1cc   : > { %671 = vmatpush.msra.mxu1 %v509_v38  ;;  %695 = vmatpush.msra.mxu0 %v533_v55 }
 0x1cd   : > { %637 = vmatpush.msrb.mxu2 %v433_v12  ;;  %657 = vmatpush.msrb.mxu3 %v465_v13 }
 0x1ce   : > { %672 = vmatpush.msra.mxu1 %v507_v42  ;;  %696 = vmatpush.msra.mxu0 %v531_v59 }
 0x1cf   : > { %638 = vmatpush.msrb.mxu2 %v431_v16  ;;  %658 = vmatpush.msrb.mxu3 %v463_v17 }
 0x1d0   : > { %673 = vmatpush.msra.mxu1 %v505_v46  ;;  %697 = vmatpush.msra.mxu0 %v529_v63 }
 0x1d1   : > { %639 = vmatpush.msrb.mxu2 %v429_v20  ;;  %659 = vmatpush.msrb.mxu3 %v461_v21 }
 0x1d2   : > { %674 = vmatpush.msra.mxu1 %v503_v50  ;;  %698 = vmatpush.msra.mxu0 %v527_v11 }
 0x1d3   : > { %640 = vmatpush.msrb.mxu2 %v427_v25  ;;  %660 = vmatpush.msrb.mxu3 %v459_v26 }
 0x1d4   : > { %675 = vmatpush.msra.mxu1 %v501_v54  ;;  %699 = vmatpush.msra.mxu0 %v525_v15 }
 0x1d5   : > { %641 = vmatpush.msrb.mxu2 %v425_v29  ;;  %661 = vmatpush.msrb.mxu3 %v457_v30 }
 0x1d6   : > { %676 = vmatpush.msra.mxu1 %v499_v58  ;;  %700 = vmatpush.msra.mxu0 %v523_v19 }
 0x1d7   : > { %642 = vmatpush.msrb.mxu2 %v423_v33  ;;  %662 = vmatpush.msrb.mxu3 %v455_v34 }
 0x1d8   : > { %677 = vmatpush.msra.mxu1 %v497_v62  ;;  %701 = vmatpush.msra.mxu0 %v521_v23 }
 0x1d9   : > { %643 = vmatpush.msrb.mxu2 %v421_v35  ;;  %663 = vmatpush.msrb.mxu3 %v453_v36 }
 0x1da   : > { %678 = vmatpush.msra.mxu1 %v495_v6  ;;  %702 = vmatpush.msra.mxu0 %v519_v28 }
 0x1dc   : > { %679 = vmatpush.msra.mxu1 %v493_v14  ;;  %703 = vmatpush.msra.mxu0 %v517_v32 }
 0x1de   : > { %680 = vmatpush.msra.mxu1 %v491_v18 }
 0x1e0   : > { %681 = vmatpush.msra.mxu1 %v489_v22 }
 0x1e2   : > { %682 = vmatpush.msra.mxu1 %v487_v27 }
 0x1e4   : > { %683 = vmatpush.msra.mxu1 %v485_v31 }
 0x215   : > { %v355_v24 = vpop.permute.xlu2 %354 }
 0x216   : > { %v1350_v38 = vmul.f32 %v355_v24, %v912_v0  ;;  %v1353_v39 = vmul.f32 %v355_v24, %v914_v1 }
 0x225   : > { %v373_v37 = vpop.permute.xlu2 %372 }
 0x226   : > { %v1368_v0 = vmul.f32 %v373_v37, %v930_v9  ;;  %v1371_v1 = vmul.f32 %v373_v37, %v932_v10 }
 0x22c   : > { %v367_v40 = vpop.permute.xlu1 %366  ;;  %v361_v41 = vpop.permute.xlu0 %360 }
 0x22d   : > { %v1356_v42 = vmul.f32 %v367_v40, %v916_v2  ;;  %v1359_v43 = vmul.f32 %v367_v40, %v922_v5  ;;  %v1362_v44 = vmul.f32 %v361_v41, %v926_v7  ;;  %v1365_v45 = vmul.f32 %v361_v41, %v928_v8 }
 0x22f   : > { %v402_v46 = vmax.f32 %v1350_v38, %v1356_v42  ;;  %v411_v2 = vmax.f32 %v1353_v39, %v1359_v43  ;;  %v382_v5 = vadd.f32 %v1362_v44, %v1350_v38  ;;  %v391_v7 = vadd.f32 %v1365_v45, %v1353_v39 }
 0x230   : > { %v403_v8 = vmax.f32 %v1362_v44, %v1368_v0  ;;  %v412_v9 = vmax.f32 %v1365_v45, %v1371_v1 }
 0x231   : > { %v383_v10 = vadd.f32 %v382_v5, %v1356_v42  ;;  %v392_v47 = vadd.f32 %v391_v7, %v1359_v43 }
 0x232   : > { %v404_v48 = vmax.f32 %v402_v46, %v403_v8  ;;  %v413_v49 = vmax.f32 %v411_v2, %v412_v9 }
 0x233   : > { %v384_v50 = vadd.f32 %v383_v10, %v1368_v0  ;;  %v393_v51 = vadd.f32 %v392_v47, %v1371_v1 }
 0x234   : > { %v405_v52 = vrot.slane %v404_v48, 4  ;;  %v414_v53 = vrot.slane %v413_v49, 4 }
 0x235   : > { %v385_v54 = vrot.slane %v384_v50, 4  ;;  %v394_v55 = vrot.slane %v393_v51, 4 }
 0x236   : > { %v406_v56 = vmax.f32 %v404_v48, %v405_v52  ;;  %v415_v57 = vmax.f32 %v413_v49, %v414_v53 }
 0x237   : > { %v386_v58 = vadd.f32 %v385_v54, %v384_v50  ;;  %v395_v59 = vadd.f32 %v394_v55, %v393_v51 }
 0x238   : > { %v407_v60 = vrot.slane %v406_v56, 2  ;;  %v416_v61 = vrot.slane %v415_v57, 2 }
 0x239   : > { %v387_v62 = vrot.slane %v386_v58, 2  ;;  %v396_v63 = vrot.slane %v395_v59, 2 }
 0x23a   : > { %v408_v3 = vmax.f32 %v406_v56, %v407_v60  ;;  %v417_v4 = vmax.f32 %v415_v57, %v416_v61 }
 0x23b   : > { %v388_v6 = vadd.f32 %v387_v62, %v386_v58  ;;  %v397_v11 = vadd.f32 %v396_v63, %v395_v59 }
 0x23c   : > { %v409_v12 = vrot.slane %v408_v3, 1  ;;  %v418_v13 = vrot.slane %v417_v4, 1 }
 0x23d   : > { %v389_v14 = vrot.slane %v388_v6, 1  ;;  %v398_v15 = vrot.slane %v397_v11, 1 }
 0x23e   : > { %v410_v16 = vmax.f32 %v408_v3, %v409_v12  ;;  %v419_v17 = vmax.f32 %v417_v4, %v418_v13 }
 0x23f   : > { %v390_v18 = vadd.f32 %v389_v14, %v388_v6  ;;  %v399_v19 = vadd.f32 %v398_v15, %v397_v11 }
 0x240   : > { %604 = vmatmul.f32.vlgmr.msrb.gmra.mxu1 %v410_v16  ;;  %624 = vmatmul.f32.vlgmr.msrb.gmra.mxu0 %v419_v17 }
 0x241   : > { %v400_v20 = vmul.f32 0.03125, %v390_v18  ;;  %v401_v21 = vmul.f32 0.03125, %v399_v19 }
 0x243   : > { %564 = vmatmul.f32.vlgmr.msra.gmra.mxu2 %v400_v20  ;;  %584 = vmatmul.f32.vlgmr.msra.gmra.mxu3 %v401_v21 }
 0x248   : > { %684 = vmatmul.f32.vlgmr.msra.gmra.mxu1 %v410_v16  ;;  %704 = vmatmul.f32.vlgmr.msra.gmra.mxu0 %v419_v17 }
 0x24b   : > { %644 = vmatmul.f32.vlgmr.msrb.gmra.mxu2 %v400_v20  ;;  %664 = vmatmul.f32.vlgmr.msrb.gmra.mxu3 %v401_v21 }
 0x2bd   : > { %v605_v22 = vpop.f32.mrf.mxu1  ;;  %v625_v26 = vpop.f32.mrf.mxu0 }
 0x2c5   : > { %v685_v33 = vpop.f32.mrf.mxu1  ;;  %v705_v35 = vpop.f32.mrf.mxu0 }
 0x2c6   : > { %v565_v23 = vpop.f32.mrf.mxu2  ;;  %v585_v24 = vpop.f32.mrf.mxu3 }
 0x2c7   : > { %v586_v25 = vadd.f32 %v585_v24, %v565_v23 }
 0x2c9   : > { %v606_v27 = vadd.f32 %v605_v22, %v586_v25 }
 0x2cb   : > { %v626_v28 = vadd.f32 %v625_v26, %v606_v27 }
 0x2cd   : > { %v832_v29 = vmul.f32 -1.442695, %v626_v28 }
 0x2ce   : > { %v645_v30 = vpop.f32.mrf.mxu2  ;;  %v665_v31 = vpop.f32.mrf.mxu3 }
 0x2cf   : > { %855 = vpow2.f32 %v832_v29  ;;  %v666_v32 = vadd.f32 %v665_v31, %v645_v30 }
 0x2d1   : > { %v686_v34 = vadd.f32 %v685_v33, %v666_v32 }
 0x2d3   : > { %v706_v36 = vadd.f32 %v705_v35, %v686_v34 }
 0x2d5   : > { %v856_v37 = vpop.eup %855  ;;  %v833_v40 = vmul.f32 -1.442695, %v706_v36 }
 0x2d6   : > { %v714_v41 = vadd.f32 1.0, %v856_v37 }
 0x2d7   : > { %857 = vpow2.f32 %v833_v40 }
 0x2d8   : > { %859 = vrcp.f32 %v714_v41  ;;  %v727_v9 = vand.u32 2147483648, %v714_v41  ;;  %v725_v47 = vand.u32 2147483647, %v714_v41  ;;  %vm721_vm12 = vweird.f32 %v714_v41 }
 0x2da   : > { %v728_v50 = vor.u32 1.1754944e-38, %v727_v9  ;;  %vm726_vm14 = vcmp.eq.f32.partialorder %v725_v47, 8.507059e+37 }
 0x2dd   : > { %v858_v46 = vpop.eup %857 }
 0x2de   : > { %v860_v2 = vpop.eup %859  ;;  %v715_v5 = vadd.f32 1.0, %v858_v46 }
 0x2df   : > { %v717_v7 = vmul.f32 %v860_v2, %v714_v41  ;;  %vm722_vm11 = vweird.f32 %v860_v2 }
 0x2e0   : > { %861 = vrcp.f32 %v715_v5  ;;  %vm723_vm13 = vmor %vm721_vm12, %vm722_vm11  ;;  %v742_v59 = vand.u32 2147483648, %v715_v5  ;;  %v740_v62 = vand.u32 2147483647, %v715_v5  ;;  %vm736_vm0 = vweird.f32 %v715_v5 }
 0x2e1   : > { %v718_v8 = vsub.f32 1.0, %v717_v7 }
 0x2e2   : > { %v743_v3 = vor.u32 1.1754944e-38, %v742_v59  ;;  %vm741_vm2 = vcmp.eq.f32.partialorder %v740_v62, 8.507059e+37 }
 0x2e3   : > { %v719_v10 = vmul.f32 %v860_v2, %v718_v8 }
 0x2e5   : > { %v720_v48 = vadd.f32 %v860_v2, %v719_v10 }
 0x2e6   : > { %v862_v49 = vpop.eup %861 }
 0x2e7   : > { %v724_v51 = vsel %vm723_vm13, %v860_v2, %v720_v48  ;;  %v732_v52 = vmul.f32 %v862_v49, %v715_v5  ;;  %vm737_vm15 = vweird.f32 %v862_v49 }
 0x2e8   : > { %v729_v53 = vsel %vm726_vm14, %v728_v50, %v724_v51  ;;  %vm738_vm1 = vmor %vm736_vm0, %vm737_vm15 }
 0x2e9   : > { %v746_v54 = vperm.slane %v729_v53, 0  ;;  %v733_v55 = vsub.f32 1.0, %v732_v52 }
 0x2eb   : > { %v748_v56 = vmul.f32 %v746_v54, %v1350_v38  ;;  %v750_v57 = vmul.f32 %v746_v54, %v1362_v44  ;;  %v752_v58 = vmul.f32 %v746_v54, %v1356_v42  ;;  %v754_v60 = vmul.f32 %v746_v54, %v1368_v0 }
 0x2ec   : > { %v734_v61 = vmul.f32 %v862_v49, %v733_v55 }
 0x2ed   : > { %756 = vst [vmem:[%s197_s10] sm:$0xff] %v748_v56 }
 0x2ee   : > { %758 = vst [vmem:[%s197_s10 + $0x10] sm:$0xff] %v750_v57  ;;  %v735_v63 = vadd.f32 %v862_v49, %v734_v61 }
 0x2ef   : > { %760 = vst [vmem:[%s197_s10 + $0x20] sm:$0xff] %v752_v58 }
 0x2f0   : > { %762 = vst [vmem:[%s197_s10 + $0x30] sm:$0xff] %v754_v60  ;;  %v739_v4 = vsel %vm738_vm1, %v862_v49, %v735_v63 }
 0x2f1   : > { %v744_v38 = vsel %vm741_vm2, %v743_v3, %v739_v4 }
 0x2f2   : > { %v747_v44 = vperm.slane %v744_v38, 0 }
 0x2f4   : > { %v749_v42 = vmul.f32 %v747_v44, %v1353_v39  ;;  %v751_v6 = vmul.f32 %v747_v44, %v1365_v45  ;;  %v753_v0 = vmul.f32 %v747_v44, %v1359_v43  ;;  %v755_v11 = vmul.f32 %v747_v44, %v1371_v1 }
 0x2f6   : > { %757 = vst [vmem:[%s197_s10 + $0x8] sm:$0xff] %v749_v42 }
 0x2f7   : > { %759 = vst [vmem:[%s197_s10 + $0x18] sm:$0xff] %v751_v6 }
 0x2f8   : > { %761 = vst [vmem:[%s197_s10 + $0x28] sm:$0xff] %v753_v0 }
 0x2f9   : > { %763 = vst [vmem:[%s197_s10 + $0x38] sm:$0xff] %v755_v11 }
 0x2fa PF: > { %s14_s15 = sadd.s32 1, %s869_s15  }
 0x2fb   : > { %p11_p4 = scmp.ge.s32.totalorder %s14_s15, 4  }
 0x2fd   :  { %13 = sbr.rel (!%p11_p4) target bundleno = 1 (0x1), region = 66 }

</bundles_post_ra>
